<compile_context>
chip_gen: v5e
topology: v5e:2x2
jax: 0.10.0
libtpu: 0.0.40
codegen_flags: <defaults>
</compile_context>

<pallas_src>
import jax
import jax.numpy as jnp
from jax.experimental import pallas as pl
from jax.experimental.pallas import tpu as pltpu


def _pick_images_per_block(B, H, row_bytes, target_block_bytes=2 * 1024 * 1024):
    """Pick g = images per block. Blocks are whole images; g divides B; sublane dim of the
    block (g*H) is 8-aligned or equals the full dim; prefer >= 2 grid steps (megacore)."""
    max_rows = max(H, target_block_bytes // max(1, row_bytes))
    candidates = [d for d in range(1, B + 1)
                  if B % d == 0 and ((d * H) % 8 == 0 or d == B)]
    pref = [d for d in candidates if (B // d) >= 2 and d * H <= max_rows]
    if pref:
        return max(pref)
    fits = [d for d in candidates if d * H <= max_rows]
    if fits:
        return max(fits)
    return min(candidates)


def basic_conv_dw3x3(x, weight, bias, gamma, beta, running_mean, running_var,
                     eps=1e-5, relu=True):
    """Fused BasicConv forward (depthwise 3x3, stride 1, pad 1, groups=C).

    x:       (B, C, H, W)   NCHW, like the PyTorch module
    weight:  (C, 1, 3, 3)   PyTorch depthwise Conv2d weight layout
    bias:    (C,) or None   conv bias (BasicConv default: None)
    gamma/beta/running_mean/running_var: (C,) BatchNorm2d parameters (inference mode)
    returns: (B, C, H, W)
    """
    B, C, H, W = x.shape
    assert weight.shape == (C, 1, 3, 3), "expected PyTorch depthwise weight (C,1,3,3)"
    WC = W * C

    # ---- fold BN (+ optional conv bias) into per-channel scale (into weights) & shift ----
    scale = gamma.astype(jnp.float32) / jnp.sqrt(running_var.astype(jnp.float32) + eps)
    shift = beta.astype(jnp.float32) - running_mean.astype(jnp.float32) * scale
    if bias is not None:
        shift = shift + bias.astype(jnp.float32) * scale

    # ---- layout plumbing (pure reshape/transpose, no compute): NCHW -> (B*H, W*C) ----
    x2d = jnp.transpose(x, (0, 2, 3, 1)).reshape(B * H, WC)

    # taps: (C,1,3,3) -> (3,3,C) -> (9,C); BN scale folded in; lane-tiled to (9, W*C);
    # column-boundary masks baked into the weights (zero where the lane-rolled tap would
    # wrap across the image's left/right edge).
    w9 = jnp.transpose(weight[:, 0, :, :], (1, 2, 0)).reshape(9, C).astype(jnp.float32)
    w9 = w9 * scale.reshape(1, C)                       # fold BN scale into weights
    w_t = jnp.tile(w9, (1, W))                          # (9, W*C): [k, w*C + c] = w9[k, c]
    col = jnp.arange(WC) // C                           # image column per lane
    left_ok = (col >= 1).astype(jnp.float32)            # dw == -1 taps (k = 0, 3, 6)
    right_ok = (col <= W - 2).astype(jnp.float32)       # dw == +1 taps (k = 2, 5, 8)
    lane_mask = jnp.ones((9, WC), jnp.float32)
    lane_mask = lane_mask.at[jnp.array([0, 3, 6])].set(left_ok[None, :])
    lane_mask = lane_mask.at[jnp.array([2, 5, 8])].set(right_ok[None, :])
    w_t = w_t * lane_mask

    shift_t = jnp.tile(shift.reshape(1, C), (1, W))     # (1, W*C)

    # ---- block selection: whole images per block, <= ~2 MiB, grid >= 2 steps if B >= 2 ----
    itemsize = jnp.dtype(x.dtype).itemsize
    g = _pick_images_per_block(B, H, WC * itemsize)
    rows_per_block = g * H
    grid = (B // g,)

    def kernel(x_ref, w_ref, shift_ref, o_ref):
        R = o_ref.shape[0]
        xf = x_ref[...].astype(jnp.float32)                               # (R, W*C)

        # Row-boundary masks, computed once per block (not per tap), applied once to each
        # sublane-rolled row variant as a 0/1 f32 multiply.
        h_idx = jax.lax.broadcasted_iota(jnp.int32, (R, 1), 0) % H        # image row
        hmask_top = (h_idx >= 1).astype(jnp.float32)                      # dh == -1 valid
        hmask_bot = (h_idx <= H - 2).astype(jnp.float32)                  # dh == +1 valid

        # 2 sublane rolls (XLU), masked once, reused for 3 taps each.
        s_up = pltpu.roll(xf, shift=1, axis=0) * hmask_top                # row above
        s_dn = pltpu.roll(xf, shift=R - 1, axis=0) * hmask_bot            # row below

        # Center tap initializes the accumulator; BN shift folded in here (no epilogue add).
        acc = xf * w_ref[4:5, :] + shift_ref[...]

        # 3 row variants x {left, (mid), right}: 6 lane rolls, plain mul+add per tap.
        for s_row, kbase in ((s_up, 0), (xf, 3), (s_dn, 6)):
            s_l = pltpu.roll(s_row, shift=C, axis=1)                      # dw == -1
            acc = acc + s_l * w_ref[kbase:kbase + 1, :]
            s_r = pltpu.roll(s_row, shift=WC - C, axis=1)                 # dw == +1
            acc = acc + s_r * w_ref[kbase + 2:kbase + 3, :]
            if kbase != 3:                                                # dw == 0 (non-center)
                acc = acc + s_row * w_ref[kbase + 1:kbase + 2, :]

        y = jnp.maximum(acc, 0.0) if relu else acc
        o_ref[...] = y.astype(o_ref.dtype)

    out2d = pl.pallas_call(
        kernel,
        out_shape=jax.ShapeDtypeStruct((B * H, WC), x.dtype),
        grid_spec=pltpu.PrefetchScalarGridSpec(
            num_scalar_prefetch=0,
            grid=grid,
            in_specs=[
                pl.BlockSpec((rows_per_block, WC), lambda i: (i, 0)),
                pl.BlockSpec((9, WC), lambda i: (0, 0)),
                pl.BlockSpec((1, WC), lambda i: (0, 0)),
            ],
            out_specs=pl.BlockSpec((rows_per_block, WC), lambda i: (i, 0)),
        ),
        compiler_params=pltpu.CompilerParams(
            dimension_semantics=("parallel",),
            vmem_limit_bytes=32 * 1024 * 1024),
    )(x2d, w_t, shift_t)

    return jnp.transpose(out2d.reshape(B, H, W, C), (0, 3, 1, 2))


def _basic_conv_ref(x, weight, bias, gamma, beta, mean, var, eps=1e-5):
    """Pure-JAX reference (padded 9-tap depthwise conv + BN + ReLU), f32 accumulation."""
    B, C, H, W = x.shape
    xh = jnp.transpose(x, (0, 2, 3, 1)).astype(jnp.float32)                 # (B,H,W,C)
    wk = jnp.transpose(weight[:, 0, :, :], (1, 2, 0)).astype(jnp.float32)   # (3,3,C)
    xp = jnp.pad(xh, ((0, 0), (1, 1), (1, 1), (0, 0)))
    acc = jnp.zeros((B, H, W, C), jnp.float32)
    for i in range(3):
        for j in range(3):
            acc = acc + xp[:, i:i + H, j:j + W, :] * wk[i, j]
    if bias is not None:
        acc = acc + bias.astype(jnp.float32)
    y = (acc - mean.astype(jnp.float32)) / jnp.sqrt(var.astype(jnp.float32) + eps)
    y = y * gamma.astype(jnp.float32) + beta.astype(jnp.float32)
    y = jnp.maximum(y, 0.0)
    return jnp.transpose(y, (0, 3, 1, 2)).astype(x.dtype)


if __name__ == "__main__":
    # BasicConv(C, C, 3, stride=1, padding=1, groups=C, bias=False, bn=True, relu=True)
    # W*C = 512 keeps the kernel's last dim lane-dense (multiple of 128); B=2 gives a
    # 2-step grid (one image per block), exercising pipelining / megacore sharding.
    B, C, H, W = 2, 32, 16, 16

    key = jax.random.PRNGKey(0)
    kx, kw, kg, kb, km, kv = jax.random.split(key, 6)

    x = jax.random.normal(kx, (B, C, H, W), dtype=jnp.float32)
    weight = jax.random.normal(kw, (C, 1, 3, 3), dtype=jnp.float32) * 0.1
    gamma = 1.0 + 0.1 * jax.random.normal(kg, (C,), dtype=jnp.float32)
    beta = 0.1 * jax.random.normal(kb, (C,), dtype=jnp.float32)
    running_mean = 0.1 * jax.random.normal(km, (C,), dtype=jnp.float32)
    running_var = jnp.abs(1.0 + 0.1 * jax.random.normal(kv, (C,), dtype=jnp.float32))

    out = basic_conv_dw3x3(x, weight, None, gamma, beta, running_mean, running_var)
    out = jax.block_until_ready(out)

    ref = _basic_conv_ref(x, weight, None, gamma, beta, running_mean, running_var)
    assert out.shape == (B, C, H, W)
    assert jnp.allclose(out, ref, atol=1e-4, rtol=1e-4), float(jnp.max(jnp.abs(out - ref)))

    print("KERNEL_OK")
</pallas_src>

<mosaic_0001>
module attributes {stable_mosaic.version = 11 : i64} {
  func.func @kernel(%arg0: i32, %arg1: memref<16x512xf32, #tpu.memory_space<vmem>>, %arg2: memref<9x512xf32, #tpu.memory_space<vmem>>, %arg3: memref<1x512xf32, #tpu.memory_space<vmem>>, %arg4: memref<16x512xf32, #tpu.memory_space<vmem>>) attributes {dimension_semantics = [#tpu.dimension_semantics<parallel>], iteration_bounds = array<i64: 2>, scalar_prefetch = 0 : i64, scratch_operands = 0 : i64, tpu.core_type = #tpu.core_type<tc>, window_params = [{transform_indices = @transform_0, window_bounds = array<i64: 16, 512>}, {pipeline_mode = #tpu.pipeline_mode<synchronous>, transform_indices = @transform_1, window_bounds = array<i64: 9, 512>}, {pipeline_mode = #tpu.pipeline_mode<synchronous>, transform_indices = @transform_2, window_bounds = array<i64: 1, 512>}, {transform_indices = @transform_3, window_bounds = array<i64: 16, 512>}]} {
    %c0 = arith.constant 0 : index
    %c0_0 = arith.constant 0 : index
    %0 = vector.load %arg1[%c0, %c0_0] : memref<16x512xf32, #tpu.memory_space<vmem>>, vector<16x512xf32>
    %1 = tpu.iota {dimensions = array<i32: 0>} : vector<16x1xi32>
    %c16_i32 = arith.constant 16 : i32
    %c0_i32 = arith.constant 0 : i32
    %2 = arith.cmpi eq, %c16_i32, %c0_i32 : i32
    %c1_i32 = arith.constant 1 : i32
    %3 = arith.select %2, %c1_i32, %c16_i32 : i32
    %4 = vector.broadcast %3 : i32 to vector<16x1xi32>
    %5 = arith.remsi %1, %4 : vector<16x1xi32>
    %c0_i32_1 = arith.constant 0 : i32
    %6 = vector.broadcast %c0_i32_1 : i32 to vector<16x1xi32>
    %7 = arith.cmpi ne, %5, %6 : vector<16x1xi32>
    %c0_i32_2 = arith.constant 0 : i32
    %8 = vector.broadcast %c0_i32_2 : i32 to vector<16x1xi32>
    %9 = arith.cmpi slt, %5, %8 : vector<16x1xi32>
    %c0_i32_3 = arith.constant 0 : i32
    %10 = arith.cmpi slt, %3, %c0_i32_3 : i32
    %11 = vector.broadcast %10 : i1 to vector<16x1xi1>
    %12 = vector.broadcast %11 : vector<16x1xi1> to vector<16x1xi1>
    %13 = arith.xori %9, %12 : vector<16x1xi1>
    %14 = arith.andi %13, %7 : vector<16x1xi1>
    %15 = vector.broadcast %3 : i32 to vector<16x1xi32>
    %16 = arith.addi %5, %15 : vector<16x1xi32>
    %17 = arith.select %14, %16, %5 : vector<16x1xi1>, vector<16x1xi32>
    %c1_i32_4 = arith.constant 1 : i32
    %18 = vector.broadcast %c1_i32_4 : i32 to vector<16x1xi32>
    %19 = arith.cmpi sge, %17, %18 : vector<16x1xi32>
    %20 = arith.extui %19 : vector<16x1xi1> to vector<16x1xi32>
    %21 = arith.sitofp %20 : vector<16x1xi32> to vector<16x1xf32>
    %c14_i32 = arith.constant 14 : i32
    %22 = vector.broadcast %c14_i32 : i32 to vector<16x1xi32>
    %23 = arith.cmpi sle, %17, %22 : vector<16x1xi32>
    %24 = arith.extui %23 : vector<16x1xi1> to vector<16x1xi32>
    %25 = arith.sitofp %24 : vector<16x1xi32> to vector<16x1xf32>
    %c1_i32_5 = arith.constant 1 : i32
    %26 = tpu.dynamic_rotate %0 by %c1_i32_5 dim 0 : vector<16x512xf32>, i32 -> vector<16x512xf32>
    %27 = vector.broadcast %21 : vector<16x1xf32> to vector<16x512xf32>
    %28 = arith.mulf %26, %27 : vector<16x512xf32>
    %c15_i32 = arith.constant 15 : i32
    %29 = tpu.dynamic_rotate %0 by %c15_i32 dim 0 : vector<16x512xf32>, i32 -> vector<16x512xf32>
    %30 = vector.broadcast %25 : vector<16x1xf32> to vector<16x512xf32>
    %31 = arith.mulf %29, %30 : vector<16x512xf32>
    %c4 = arith.constant 4 : index
    %c0_6 = arith.constant 0 : index
    %32 = vector.load %arg2[%c4, %c0_6] : memref<9x512xf32, #tpu.memory_space<vmem>>, vector<1x512xf32>
    %33 = vector.broadcast %32 : vector<1x512xf32> to vector<16x512xf32>
    %34 = arith.mulf %0, %33 : vector<16x512xf32>
    %c0_7 = arith.constant 0 : index
    %c0_8 = arith.constant 0 : index
    %35 = vector.load %arg3[%c0_7, %c0_8] : memref<1x512xf32, #tpu.memory_space<vmem>>, vector<1x512xf32>
    %36 = vector.broadcast %35 : vector<1x512xf32> to vector<16x512xf32>
    %37 = arith.addf %34, %36 : vector<16x512xf32>
    %c32_i32 = arith.constant 32 : i32
    %38 = tpu.dynamic_rotate %28 by %c32_i32 dim 1 : vector<16x512xf32>, i32 -> vector<16x512xf32>
    %c0_9 = arith.constant 0 : index
    %c0_10 = arith.constant 0 : index
    %39 = vector.load %arg2[%c0_9, %c0_10] : memref<9x512xf32, #tpu.memory_space<vmem>>, vector<1x512xf32>
    %40 = vector.broadcast %39 : vector<1x512xf32> to vector<16x512xf32>
    %41 = arith.mulf %38, %40 : vector<16x512xf32>
    %42 = arith.addf %37, %41 : vector<16x512xf32>
    %c480_i32 = arith.constant 480 : i32
    %43 = tpu.dynamic_rotate %28 by %c480_i32 dim 1 : vector<16x512xf32>, i32 -> vector<16x512xf32>
    %c2 = arith.constant 2 : index
    %c0_11 = arith.constant 0 : index
    %44 = vector.load %arg2[%c2, %c0_11] : memref<9x512xf32, #tpu.memory_space<vmem>>, vector<1x512xf32>
    %45 = vector.broadcast %44 : vector<1x512xf32> to vector<16x512xf32>
    %46 = arith.mulf %43, %45 : vector<16x512xf32>
    %47 = arith.addf %42, %46 : vector<16x512xf32>
    %c1 = arith.constant 1 : index
    %c0_12 = arith.constant 0 : index
    %48 = vector.load %arg2[%c1, %c0_12] : memref<9x512xf32, #tpu.memory_space<vmem>>, vector<1x512xf32>
    %49 = vector.broadcast %48 : vector<1x512xf32> to vector<16x512xf32>
    %50 = arith.mulf %28, %49 : vector<16x512xf32>
    %51 = arith.addf %47, %50 : vector<16x512xf32>
    %c32_i32_13 = arith.constant 32 : i32
    %52 = tpu.dynamic_rotate %0 by %c32_i32_13 dim 1 : vector<16x512xf32>, i32 -> vector<16x512xf32>
    %c3 = arith.constant 3 : index
    %c0_14 = arith.constant 0 : index
    %53 = vector.load %arg2[%c3, %c0_14] : memref<9x512xf32, #tpu.memory_space<vmem>>, vector<1x512xf32>
    %54 = vector.broadcast %53 : vector<1x512xf32> to vector<16x512xf32>
    %55 = arith.mulf %52, %54 : vector<16x512xf32>
    %56 = arith.addf %51, %55 : vector<16x512xf32>
    %c480_i32_15 = arith.constant 480 : i32
    %57 = tpu.dynamic_rotate %0 by %c480_i32_15 dim 1 : vector<16x512xf32>, i32 -> vector<16x512xf32>
    %c5 = arith.constant 5 : index
    %c0_16 = arith.constant 0 : index
    %58 = vector.load %arg2[%c5, %c0_16] : memref<9x512xf32, #tpu.memory_space<vmem>>, vector<1x512xf32>
    %59 = vector.broadcast %58 : vector<1x512xf32> to vector<16x512xf32>
    %60 = arith.mulf %57, %59 : vector<16x512xf32>
    %61 = arith.addf %56, %60 : vector<16x512xf32>
    %c32_i32_17 = arith.constant 32 : i32
    %62 = tpu.dynamic_rotate %31 by %c32_i32_17 dim 1 : vector<16x512xf32>, i32 -> vector<16x512xf32>
    %c6 = arith.constant 6 : index
    %c0_18 = arith.constant 0 : index
    %63 = vector.load %arg2[%c6, %c0_18] : memref<9x512xf32, #tpu.memory_space<vmem>>, vector<1x512xf32>
    %64 = vector.broadcast %63 : vector<1x512xf32> to vector<16x512xf32>
    %65 = arith.mulf %62, %64 : vector<16x512xf32>
    %66 = arith.addf %61, %65 : vector<16x512xf32>
    %c480_i32_19 = arith.constant 480 : i32
    %67 = tpu.dynamic_rotate %31 by %c480_i32_19 dim 1 : vector<16x512xf32>, i32 -> vector<16x512xf32>
    %c8 = arith.constant 8 : index
    %c0_20 = arith.constant 0 : index
    %68 = vector.load %arg2[%c8, %c0_20] : memref<9x512xf32, #tpu.memory_space<vmem>>, vector<1x512xf32>
    %69 = vector.broadcast %68 : vector<1x512xf32> to vector<16x512xf32>
    %70 = arith.mulf %67, %69 : vector<16x512xf32>
    %71 = arith.addf %66, %70 : vector<16x512xf32>
    %c7 = arith.constant 7 : index
    %c0_21 = arith.constant 0 : index
    %72 = vector.load %arg2[%c7, %c0_21] : memref<9x512xf32, #tpu.memory_space<vmem>>, vector<1x512xf32>
    %73 = vector.broadcast %72 : vector<1x512xf32> to vector<16x512xf32>
    %74 = arith.mulf %31, %73 : vector<16x512xf32>
    %75 = arith.addf %71, %74 : vector<16x512xf32>
    %cst = arith.constant 0.000000e+00 : f32
    %76 = vector.broadcast %cst : f32 to vector<16x512xf32>
    %77 = arith.maximumf %75, %76 : vector<16x512xf32>
    %c0_22 = arith.constant 0 : index
    %c0_23 = arith.constant 0 : index
    %78 = vector.load %arg4[%c0_22, %c0_23] : memref<16x512xf32, #tpu.memory_space<vmem>>, vector<16x512xf32>
    tpu.vector_store %arg4[%c0_22, %c0_23], %77 {strides = array<i32>} : memref<16x512xf32, #tpu.memory_space<vmem>>, vector<16x512xf32>,
    return
  }
  func.func @transform_0(%arg0: i32) -> (i32, i32) {
    %c0_i32 = arith.constant 0 : i32
    %c0_i32_0 = arith.constant 0 : i32
    return %arg0, %c0_i32 : i32, i32
  }
  func.func @transform_1(%arg0: i32) -> (i32, i32) {
    %c0_i32 = arith.constant 0 : i32
    %c0_i32_0 = arith.constant 0 : i32
    %c0_i32_1 = arith.constant 0 : i32
    return %c0_i32, %c0_i32_0 : i32, i32
  }
  func.func @transform_2(%arg0: i32) -> (i32, i32) {
    %c0_i32 = arith.constant 0 : i32
    %c0_i32_0 = arith.constant 0 : i32
    %c0_i32_1 = arith.constant 0 : i32
    return %c0_i32, %c0_i32_0 : i32, i32
  }
  func.func @transform_3(%arg0: i32) -> (i32, i32) {
    %c0_i32 = arith.constant 0 : i32
    %c0_i32_0 = arith.constant 0 : i32
    return %arg0, %c0_i32 : i32, i32
  }
}

</mosaic_0001>

<bundles_post_ra>
// kernel: tpu_custom_call.1
= control target key start
LH: loop header
LB: loop body
LE: loop exit
PB: predicated region body
PF: predicated region fallthrough
CT: control target
= control target key end

     0   :  { %8 = vsyncpa [#allocation3], 0  ;;  %s1784_s0 = inlined_call_operand.hbm [shape: f32[32,512], index: 0, kind: input, shape index: {}]   ;;  %s1785_s1 = inlined_call_operand.hbm [shape: f32[9,512], index: 1, kind: input, shape index: {}]   ;;  %s1786_s2 = inlined_call_operand.hbm [shape: f32[1,512], index: 2, kind: input, shape index: {}]   ;;  %s1787_s3 = inlined_call_operand.hbm [shape: f32[32,512], index: 3, kind: output, shape index: {}]  }
   0x1   :  { %10 = vsyncpa [#allocation3 + $0x1], 0 }
   0x2   :  { %11 = vsyncpa [#allocation6], 0 }
   0x3   :  { %12 = vsyncpa [#allocation4], 0 }
   0x4   :  { %14 = vsyncpa [#allocation4 + $0x1], 0  ;;  %s1136_s12 = smov 0   ;;  %s1138_s13 = smov 0  }
   0x5   :  { %s1140_s14 = smov 0   ;;  %s1142_s15 = smov 0  }
   0x6 LB: > { %s1157_s16 = sadd.s32 4294967295, %s1106_s15   ;;  %s847_s17 = sadd.s32 4294967294, %s1106_s15   ;;  %s1106_s15 = sphi %s1142_s15, %s1808_s15   ;;  %s1102_s14 = sphi %s1140_s14, %s1807_s14   ;;  %s1098_s13 = sphi %s1138_s13, %s1806_s13   ;;  %s1094_s12 = sphi %s1136_s12, %s1805_s12  }
   0x7   : > { %p40_p0 = scmp.ne.s32.totalorder %s1098_s13, %s1094_s12  ;;  %p41_p1 = scmp.eq.s32.totalorder %s1157_s16, 0 }
   0x8   : > { %p106_p2 = scmp.eq.s32.totalorder %s1157_s16, 1  ;;  %p112_p3 = scmp.eq.s32.totalorder %s847_s17, 1 }
   0x9   : > { %p1166_p4 = por %p41_p1, %p40_p0  ;;  %p848_p5 = scmp.ge.s32.totalorder %s1106_s15, 1 }
   0xa   : > { %p1171_p6 = por %p112_p3, %p40_p0  ;;  %p119_p7 = scmp.lt.s32.totalorder %s1106_s15, 3 }
   0xb   : > { %s130_s22 = sshll.u32 %s1785_s1, 4  ;;  %s1108_s24 = smov [#allocation5]   ;;  %s131_s22 = int_to_ptr.hbm [resolvable:$true] %s130_s22 }
   0xc   : > { %p1179_p8 = pnand %p848_p5, %p119_p7  ;;  %s132_s25 = sshll.u32 %s1108_s24, 4  ;;  %s133_s25 = int_to_ptr.vmem [resolvable:$true] %s132_s25 }
   0xd   : > { %s145_s28 = sshll.u32 %s1786_s2, 4  ;;  %s1109_s29 = smov 512   ;;  %s146_s28 = int_to_ptr.hbm [resolvable:$true] %s145_s28 }
   0xe   : > { %p885_p9 = pneg %p1179_p8  ;;  %s1110_s30 = smov 32  }
   0xf   : > { %s1111_s4 = smov [#allocation7]   ;;  %s1195_s6 = sadd.s32 1, %s1106_s15  }
  0x10   : > { %p886_p10 = pnand %p885_p9, %p41_p1  ;;  %s147_s5 = sshll.u32 %s1111_s4, 4  ;;  %s148_s5 = int_to_ptr.vmem [resolvable:$true] %s147_s5 }
  0x11   : > { %s27_s7 = sadd.s32 1, %s1102_s14  ;;  %s24_s8 = ssub.s32 %s1106_s15, %s1195_s6 }
  0x12   : > { %888 = dma.hbm_to_vmem [thread:$0]  (!%p886_p10), %s131_s22, 1024, %s133_s25, [#allocation6], %s1109_s29, %s1109_s29, %s1110_s30  }
  0x13   : > { %891 = dma.hbm_to_vmem [thread:$0]  (!%p886_p10), %s146_s28, 64, %s148_s5, [#allocation6]  }
  0x14   : > { %p34_p12 = scmp.ne.s32.totalorder %s1102_s14, %s1098_s13  ;;  %p25_p13 = scmp.eq.s32.totalorder %s24_s8, 0 }
  0x15   : > { %p35_p0 = scmp.eq.s32.totalorder %s1106_s15, 0  ;;  %p902_p5 = scmp.lt.s32.totalorder %s1106_s15, 2 }
  0x16   : > { %p1205_p3 = por %p106_p2, %p34_p12  ;;  %s158_s11 = sand.u32 1, %s1102_s14  }
  0x17   : > { %s1211_s10 = scalar_select %p25_p13, %s1102_s14, %s27_s7  }
  0x18   : > { %p36_p7 = por %p35_p0, %p34_p12  ;;  %s852_s17 = sshll.u32 %s158_s11, 6 }
  0x19   : > { %s870_s20 = sshll.u32 %s1106_s15, 6  ;;  %s162_s25 = scalar_lea.vmem [#allocation2], %s852_s17 }
  0x1a   : > { %s168_s24 = scalar_lea.hbm %s1784_s0, %s870_s20  ;;  %s171_s26 = sshll.u32 %s162_s25, 4  ;;  %s172_s26 = int_to_ptr.vmem [resolvable:$true] %s171_s26 }
  0x1b   : > { %s169_s27 = sshll.u32 %s168_s24, 4  ;;  %p1218_p2 = pnand %p902_p5, %p36_p7  ;;  %s170_s27 = int_to_ptr.hbm [resolvable:$true] %s169_s27 }
  0x1c   : > { %s159_s4 = scalar_lea.sflag [#allocation3], %s158_s11  ;;  %s1006_s5 = sshra.s32 %s170_s27, 4  ;;  %s1007_s5 = int_to_ptr.hbm [resolvable:$true] %s1006_s5 }
  0x1d   : > { %s1008_s7 = scalar_lea.hbm %s1007_s5, 64  ;;  %p1010_p10 = pneg %p1218_p2 }
  0x1e   : > { %p1009_p9 = scmp.ne.s32.totalorder %s1007_s5, %s1008_s7  ;;  %s1013_s20 = scalar_lea.hbm %s1784_s0, 128 }
  0x1f   : > { %p1014_p0 = scmp.lt.s32.totalorder %s1007_s5, %s1784_s0  ;;  %p1015_p5 = scmp.lt.s32.totalorder %s1013_s20, %s1008_s7 }
  0x20   : > { %p1011_p12 = pnand %p1010_p10, %p1009_p9 }
  0x21   : > { %p1016_p7 = por %p1015_p5, %p1014_p0 }
  0x22   : > { %p1012_p13 = pneg %p1011_p12 }
  0x24   : > { %p1017_p11 = pnand %p1016_p7, %p1012_p13 }
  0x26   : > { %1020 = shalt.err (!%p1017_p11)
}
  0x27   : > { %895 = dma.hbm_to_vmem [thread:$0]  (!%p1218_p2), %s170_s27, 1024, %s172_s26, %s159_s4, %s1109_s29, %s1109_s29, %s1110_s30  }
  0x28   : > { %183 = sbr.rel (%p1179_p8) target bundleno = 305 (0x131), region = 32  ;;  %s1238_s11 = sand.u32 (!%p1179_p8), 1, %s1098_s13  }
  0x29   : > { %s857_s24 = sshll.u32 (!%p1179_p8), %s1238_s11, 6  ;;  %s186_s25 = scalar_lea.sflag (!%p1179_p8), [#allocation3], %s1238_s11 }
  0x2a   : > { %s1244_s5 = scalar_lea.vmem (!%p1179_p8), [#allocation2], %s857_s24 }
  0x2d   : > { %1081 = dma.done.wait (%p1166_p4), %s186_s25, 1024  }
  0x2e   : > { %1083 = vsyncadd (%p1166_p4), %s186_s25, 4294966272 }
  0x2f   : > { %1085 = dma.done.wait (%p41_p1), [#allocation6], 1088  }
  0x30   : > { %1087 = vsyncadd (%p41_p1), [#allocation6], 4294966208  ;;  %v233_v0 = vlaneseq  ;;  %v1259_v3 = vld [vmem:[%s1244_s5 + $0x10] sm:$0xff]  ;;  %v1268_v7 = vld [vmem:[%s1244_s5 + $0x8] sm:$0xff]  ;;  %s1112_s18 = smov 32   ;;  %v1113_v18 = vmov 0.0  }
  0x31   : > { %v1262_v4 = vld [vmem:[%s1244_s5 + $0x30] sm:$0xff]  ;;  %v274_v5 = vrot.slane %v1259_v3, 7  ;;  %v1271_v8 = vld [vmem:[%s1244_s5 + $0x28] sm:$0xff]  ;;  %v273_v9 = vrot.slane %v1268_v7, 7  ;;  %v1276_v11 = vld [vmem:[%s1244_s5] sm:$0xff]  ;;  %s1114_s23 = smov 96  }
  0x32   : > { %v1255_v1 = vshrl.u32 %v233_v0, 7  ;;  %v278_v6 = vrot.slane %v1262_v4, 7  ;;  %v277_v10 = vrot.slane %v1271_v8, 7  ;;  %v1279_v12 = vld [vmem:[%s1244_s5 + $0x20] sm:$0xff]  ;;  %v272_v14 = vrot.slane %v1276_v11, 7  ;;  %v1310_v24 = vld [vmem:[%s1244_s5 + $0x18] sm:$0xff] }
  0x33   : > { %v276_v15 = vrot.slane %v1279_v12, 7  ;;  %v1313_v25 = vld [vmem:[%s1244_s5 + $0x38] sm:$0xff]  ;;  %v275_v28 = vrot.slane %v1310_v24, 7  ;;  %v298_v33 = vrot.slane %v1268_v7, 1  ;;  %v302_v34 = vrot.slane %v1271_v8, 1  ;;  %s1720_s29 = scalar_lea.vmem [#allocation8], %s857_s24 }
  0x34   : > { %v240_v2 = vand.u32 15, %v1255_v1  ;;  %vm280_vm0 = vcmp.lt.s32.totalorder %v1255_v1, 1  ;;  %v279_v29 = vrot.slane %v1313_v25, 7  ;;  %v235_v35 = vadd.s32 8, %v1255_v1  ;;  %s872_s30 = sshll.u32 %s1157_s16, 6  ;;  %s752_s28 = sshll.u32 %s1720_s29, 4  ;;  %s753_s28 = int_to_ptr.vmem [resolvable:$true] %s752_s28 }
  0x35   : > { %v1283_v13 = vsel %vm280_vm0, %v274_v5, %v278_v6  ;;  %v1291_v16 = vsel %vm280_vm0, %v273_v9, %v277_v10  ;;  %v1297_v17 = vsel %vm280_vm0, %v272_v14, %v276_v15  ;;  %v287_v20 = vsel %vm280_vm0, %v278_v6, %v274_v5  ;;  %s751_s27 = scalar_lea.hbm %s1787_s3, %s872_s30  ;;  %s739_s7 = scalar_lea.sflag [#allocation4], %s1238_s11 }
  0x36   : > { %vm260_vm1 = vcmp.ge.s32.totalorder %v240_v2, 1  ;;  %369 = vrot.lane.b32.xlu2 %v1283_v13, %s1112_s18  ;;  %365 = vrot.lane.b32.xlu1 %v1291_v16, %s1112_s18  ;;  %v286_v21 = vsel %vm280_vm0, %v277_v10, %v273_v9  ;;  %v285_v22 = vsel %vm280_vm0, %v276_v15, %v272_v14  ;;  %v288_v30 = vsel %vm280_vm0, %v279_v29, %v275_v28  ;;  %v1480_v2 = vld [vmem:[#allocation5 + $0x4] ss:$8 sm:$0xf]  ;;  %s754_s4 = sshll.u32 %s751_s27, 4  ;;  %s1056_s22 = scalar_lea.hbm %s1787_s3, 128  ;;  %s755_s4 = int_to_ptr.hbm [resolvable:$true] %s754_s4 }
  0x37   : > { %v861_v19 = vsel %vm260_vm1, 1.0, %v1113_v18  ;;  %361 = vrot.lane.b32.xlu0 %v1297_v17, %s1112_s18  ;;  %v1331_v31 = vsel %vm280_vm0, %v275_v28, %v279_v29  ;;  %v297_v36 = vrot.slane %v1276_v11, 1  ;;  %v301_v37 = vrot.slane %v1279_v12, 1  ;;  %v1505_v28 = vld [vmem:[#allocation5] ss:$8 sm:$0xf] }
  0x38   : > { %v1307_v23 = vmul.f32 %v861_v19, %v287_v20  ;;  %v1315_v26 = vmul.f32 %v861_v19, %v286_v21  ;;  %v1317_v27 = vmul.f32 %v861_v19, %v285_v22  ;;  %v1333_v32 = vmul.f32 %v861_v19, %v288_v30  ;;  %v1497_v19 = vld [vmem:[#allocation7] sm:$0xf]  ;;  %s1050_s8 = sshra.s32 %s755_s4, 4  ;;  %s1051_s8 = int_to_ptr.hbm [resolvable:$true] %s1050_s8 }
  0x39   : > { %v247_v38 = vand.u32 15, %v235_v35  ;;  %vm305_vm2 = vcmp.lt.s32.totalorder %v1255_v1, 7  ;;  %v299_v44 = vrot.slane %v1259_v3, 1  ;;  %v303_v45 = vrot.slane %v1262_v4, 1  ;;  %s1052_s17 = scalar_lea.hbm %s1051_s8, 64  ;;  %p1057_p11 = scmp.lt.s32.totalorder %s1051_s8, %s1787_s3 }
  0x3a   : > { %v311_v39 = vsel %vm305_vm2, %v302_v34, %v298_v33  ;;  %v310_v40 = vsel %vm305_vm2, %v301_v37, %v297_v36  ;;  %v300_v48 = vrot.slane %v1310_v24, 1  ;;  %v304_v49 = vrot.slane %v1313_v25, 1  ;;  %v1499_v20 = vld [vmem:[#allocation5 + $0x2] ss:$8 sm:$0xf]  ;;  %p1053_p1 = scmp.ne.s32.totalorder %s1051_s8, %s1052_s17  ;;  %p1058_p2 = scmp.lt.s32.totalorder %s1056_s22, %s1052_s17 }
  0x3b   : > { %vm267_vm3 = vcmp.le.s32.totalorder %v247_v38, 14  ;;  %v312_v46 = vsel %vm305_vm2, %v303_v45, %v299_v44  ;;  %v1411_v52 = vsel %vm305_vm2, %v297_v36, %v301_v37  ;;  %v1421_v53 = vsel %vm305_vm2, %v298_v33, %v302_v34 }
  0x3c   : > { %v862_v41 = vsel %vm267_vm3, 1.0, %v1113_v18  ;;  %v313_v50 = vsel %vm305_vm2, %v304_v49, %v300_v48  ;;  %v1431_v55 = vsel %vm305_vm2, %v300_v48, %v304_v49  ;;  %v1435_v56 = vsel %vm305_vm2, %v299_v44, %v303_v45  ;;  %v1495_v18 = vld [vmem:[#allocation5 + $0x1] ss:$8 sm:$0xf]  ;;  %p1054_p4 = pnand %p1053_p1, %p1205_p3  ;;  %p1059_p9 = por %p1058_p2, %p1057_p11 }
  0x3d   : > { %v1379_v42 = vmul.f32 %v862_v41, %v311_v39  ;;  %v1381_v43 = vmul.f32 %v862_v41, %v310_v40  ;;  %v1389_v47 = vmul.f32 %v862_v41, %v312_v46  ;;  %v1403_v51 = vmul.f32 %v862_v41, %v313_v50 }
  0x3e   : > { %367 = vrot.lane.b32.xlu2 %v1307_v23, %s1112_s18  ;;  %363 = vrot.lane.b32.xlu1 %v1315_v26, %s1112_s18  ;;  %v1452_v59 = vand.u32 127, %v233_v0  ;;  %v1792_v14 = vperm.slane %v1480_v2, 3  ;;  %v1791_v21 = vperm.slane %v1497_v19, 3  ;;  %v325_v29 = vperm.slane %v1480_v2, 0  ;;  %p1055_p8 = pneg %p1054_p4 }
  0x3f   : > { %359 = vrot.lane.b32.xlu0 %v1317_v27, %s1112_s18  ;;  %v1790_v30 = vperm.slane %v1505_v28, 3  ;;  %v1788_v34 = vperm.slane %v1495_v18, 3  ;;  %v1789_v35 = vperm.slane %v1499_v20, 3  ;;  %v343_v37 = vperm.slane %v1497_v19, 0 }
  0x40   : > { %vm377_vm4 = vcmp.lt.s32.totalorder %v1452_v59, 32  ;;  %vm428_vm5 = vcmp.lt.s32.totalorder %v1452_v59, 96  ;;  %v336_v22 = vmul.f32 %v1792_v14, %v1310_v24  ;;  %v388_v41 = vperm.slane %v1505_v28, 0  ;;  %p1060_p10 = pnand %p1059_p9, %p1055_p8 }
  0x41   : > { %v333_v44 = vmul.f32 %v325_v29, %v1276_v11  ;;  %v337_v48 = vmul.f32 %v325_v29, %v1279_v12  ;;  %v467_v50 = vperm.slane %v1495_v18, 0 }
  0x42   : > { %v354_v39 = vadd.f32 %v1791_v21, %v336_v22 }
  0x43   : > { %v355_v22 = vadd.f32 %v343_v37, %v337_v48 }
  0x46   : > { %412 = vrot.lane.b32.xlu2 %v1317_v27, %s1114_s23  ;;  %373 = vrot.lane.b32.xlu1 %v1331_v31, %s1112_s18 }
  0x47   : > { %371 = vrot.lane.b32.xlu0 %v1333_v32, %s1112_s18 }
  0x4e   : > { %418 = vrot.lane.b32.xlu2 %v1291_v16, %s1114_s23  ;;  %416 = vrot.lane.b32.xlu1 %v1315_v26, %s1114_s23 }
  0x4f   : > { %414 = vrot.lane.b32.xlu0 %v1297_v17, %s1114_s23 }
  0x56   : > { %424 = vrot.lane.b32.xlu2 %v1333_v32, %s1114_s23  ;;  %422 = vrot.lane.b32.xlu1 %v1283_v13, %s1114_s23 }
  0x57   : > { %420 = vrot.lane.b32.xlu0 %v1307_v23, %s1114_s23 }
  0x5e   : > { %493 = vrot.lane.b32.xlu2 %v1279_v12, %s1112_s18  ;;  %491 = vrot.lane.b32.xlu1 %v1276_v11, %s1112_s18 }
  0x5f   : > { %426 = vrot.lane.b32.xlu0 %v1331_v31, %s1114_s23 }
  0x66   : > { %499 = vrot.lane.b32.xlu2 %v1259_v3, %s1112_s18  ;;  %497 = vrot.lane.b32.xlu1 %v1271_v8, %s1112_s18 }
  0x67   : > { %495 = vrot.lane.b32.xlu0 %v1268_v7, %s1112_s18 }
  0x6e   : > { %505 = vrot.lane.b32.xlu2 %v1313_v25, %s1112_s18  ;;  %503 = vrot.lane.b32.xlu1 %v1310_v24, %s1112_s18 }
  0x6f   : > { %501 = vrot.lane.b32.xlu0 %v1262_v4, %s1112_s18 }
  0x76   : > { %546 = vrot.lane.b32.xlu2 %v1268_v7, %s1114_s23  ;;  %544 = vrot.lane.b32.xlu1 %v1279_v12, %s1114_s23 }
  0x77   : > { %542 = vrot.lane.b32.xlu0 %v1276_v11, %s1114_s23 }
  0x7e   : > { %552 = vrot.lane.b32.xlu2 %v1262_v4, %s1114_s23  ;;  %550 = vrot.lane.b32.xlu1 %v1259_v3, %s1114_s23 }
  0x7f   : > { %548 = vrot.lane.b32.xlu0 %v1271_v8, %s1114_s23 }
  0x86   : > { %593 = vrot.lane.b32.xlu2 %v1411_v52, %s1112_s18  ;;  %556 = vrot.lane.b32.xlu1 %v1313_v25, %s1114_s23 }
  0x87   : > { %554 = vrot.lane.b32.xlu0 %v1310_v24, %s1114_s23 }
  0x8e   : > { %599 = vrot.lane.b32.xlu2 %v1379_v42, %s1112_s18  ;;  %597 = vrot.lane.b32.xlu1 %v1421_v53, %s1112_s18 }
  0x8f   : > { %595 = vrot.lane.b32.xlu0 %v1381_v43, %s1112_s18 }
  0x90   : > { %v370_v54 = vpop.permute.xlu2 %369 }
  0x96   : > { %605 = vrot.lane.b32.xlu2 %v1431_v55, %s1112_s18  ;;  %603 = vrot.lane.b32.xlu1 %v1389_v47, %s1112_s18 }
  0x97   : > { %601 = vrot.lane.b32.xlu0 %v1435_v56, %s1112_s18 }
  0x98   : > { %v368_v57 = vpop.permute.xlu2 %367 }
  0x9e   : > { %646 = vrot.lane.b32.xlu2 %v1381_v43, %s1114_s23  ;;  %644 = vrot.lane.b32.xlu1 %v1411_v52, %s1114_s23 }
  0x9f   : > { %607 = vrot.lane.b32.xlu0 %v1403_v51, %s1112_s18 }
  0xa0   : > { %v1449_v58 = vpop.permute.xlu2 %412 }
  0xa6   : > { %652 = vrot.lane.b32.xlu2 %v1435_v56, %s1114_s23  ;;  %650 = vrot.lane.b32.xlu1 %v1379_v42, %s1114_s23 }
  0xa7   : > { %648 = vrot.lane.b32.xlu0 %v1421_v53, %s1114_s23 }
  0xa8   : > { %v1461_v60 = vpop.permute.xlu2 %418  ;;  %v366_v61 = vpop.permute.xlu1 %365 }
  0xa9   : > { %v1465_v62 = vsel %vm377_vm4, %v366_v61, %v370_v54  ;;  %v362_v63 = vpop.permute.xlu0 %361 }
  0xaa   : > { %v1469_v0 = vsel %vm377_vm4, %v362_v63, %v366_v61  ;;  %v326_v61 = vperm.slane %v1480_v2, 1 }
  0xae   : > { %658 = vrot.lane.b32.xlu2 %v1403_v51, %s1114_s23  ;;  %656 = vrot.lane.b32.xlu1 %v1431_v55, %s1114_s23 }
  0xaf   : > { %654 = vrot.lane.b32.xlu0 %v1389_v47, %s1114_s23 }
  0xb0   : > { %v1478_v1 = vpop.permute.xlu2 %424  ;;  %v364_v5 = vpop.permute.xlu1 %363 }
  0xb1   : > { %v435_v6 = vsel %vm428_vm5, %v1478_v1, %v1449_v58  ;;  %v1488_v9 = vsel %vm377_vm4, %v364_v5, %v368_v57  ;;  %v360_v10 = vpop.permute.xlu0 %359 }
  0xb2   : > { %v1493_v15 = vsel %vm377_vm4, %v360_v10, %v364_v5  ;;  %v451_v11 = vmul.f32 %v1789_v35, %v435_v6  ;;  %v344_v6 = vperm.slane %v1497_v19, 1  ;;  %v334_v35 = vmul.f32 %v326_v61, %v1268_v7 }
  0xb3   : > { %v441_v7 = vperm.slane %v1499_v20, 1 }
  0xb8   : > { %v1509_v33 = vpop.permute.xlu2 %493  ;;  %v374_v36 = vpop.permute.xlu1 %373 }
  0xb9   : > { %v1516_v38 = vsel %vm377_vm4, %v370_v54, %v374_v36  ;;  %v385_v24 = vsel %vm377_vm4, %v374_v36, %v362_v63  ;;  %v372_v40 = vpop.permute.xlu0 %371  ;;  %v478_v54 = vmul.f32 %v1788_v34, %v1333_v32  ;;  %v351_v63 = vadd.f32 %v343_v37, %v333_v44 }
  0xba   : > { %v378_v45 = vsel %vm377_vm4, %v368_v57, %v372_v40  ;;  %v384_v46 = vsel %vm377_vm4, %v372_v40, %v360_v10  ;;  %v440_v10 = vperm.slane %v1499_v20, 0  ;;  %v400_v29 = vmul.f32 %v388_v41, %v385_v24 }
  0xbb   : > { %v399_v49 = vmul.f32 %v1790_v30, %v378_v45  ;;  %v396_v5 = vmul.f32 %v388_v41, %v384_v46  ;;  %v468_v45 = vperm.slane %v1495_v18, 1  ;;  %v475_v32 = vmul.f32 %v467_v50, %v1317_v27 }
  0xbc   : > { %v327_v34 = vperm.slane %v1480_v2, 2  ;;  %v338_v44 = vmul.f32 %v326_v61, %v1271_v8  ;;  %v389_v46 = vperm.slane %v1505_v28, 1  ;;  %v1560_v8 = vld [vmem:[#allocation5 + $0x3] ss:$8 sm:$0xf]  ;;  %v352_v61 = vadd.f32 %v344_v6, %v334_v35 }
  0xbd   : > { %v407_v57 = vadd.f32 %v399_v49, %v354_v39  ;;  %v404_v27 = vadd.f32 %v396_v5, %v351_v63  ;;  %v518_v14 = vperm.slane %v1560_v8, 0 }
  0xbe   : > { %v335_v48 = vmul.f32 %v327_v34, %v1259_v3  ;;  %v390_v3 = vperm.slane %v1505_v28, 2  ;;  %v356_v5 = vadd.f32 %v344_v6, %v338_v44  ;;  %v476_v44 = vmul.f32 %v468_v45, %v1315_v26 }
  0xbf   : > { %v459_v36 = vadd.f32 %v451_v11, %v407_v57  ;;  %v479_v57 = vmul.f32 %v467_v50, %v1297_v17 }
  0xc0   : > { %v1540_v40 = vpop.permute.xlu2 %499  ;;  %v417_v39 = vpop.permute.xlu1 %416  ;;  %v398_v17 = vmul.f32 %v390_v3, %v1488_v9  ;;  %v339_v9 = vmul.f32 %v327_v34, %v1262_v4 }
  0xc1   : > { %v433_v37 = vsel %vm428_vm5, %v1449_v58, %v417_v39  ;;  %v1551_v24 = vpop.permute.xlu0 %414  ;;  %v1553_v41 = vadd.f32 %v478_v54, %v459_v36  ;;  %v408_v58 = vadd.f32 %v400_v29, %v355_v22  ;;  %v480_v54 = vmul.f32 %v468_v45, %v1291_v16 }
  0xc2   : > { %v448_v49 = vmul.f32 %v440_v10, %v433_v37  ;;  %v434_v11 = vsel %vm428_vm5, %v1551_v24, %v1461_v60  ;;  %v345_v36 = vperm.slane %v1497_v19, 2  ;;  %v401_v37 = vmul.f32 %v389_v46, %v1469_v0 }
  0xc3   : > { %v452_v30 = vmul.f32 %v440_v10, %v434_v11  ;;  %v397_v16 = vmul.f32 %v389_v46, %v1493_v15  ;;  %v442_v29 = vperm.slane %v1499_v20, 2  ;;  %v1798_v0 = vperm.slane %v1495_v18, 2 }
  0xc4   : > { %v456_v63 = vadd.f32 %v448_v49, %v404_v27  ;;  %v353_v12 = vadd.f32 %v345_v36, %v335_v48  ;;  %v409_v15 = vadd.f32 %v401_v37, %v356_v5  ;;  %v402_v37 = vmul.f32 %v390_v3, %v1465_v62 }
  0xc5   : > { %v460_v21 = vadd.f32 %v452_v30, %v408_v58  ;;  %v477_v30 = vmul.f32 %v1798_v0, %v1307_v23  ;;  %v405_v27 = vadd.f32 %v397_v16, %v352_v61  ;;  %v357_v58 = vadd.f32 %v345_v36, %v339_v9 }
  0xc6   : > { %v1571_v50 = vadd.f32 %v475_v32, %v456_v63  ;;  %v406_v4 = vadd.f32 %v398_v17, %v353_v12  ;;  %v1800_v63 = vperm.slane %v1497_v19, 3  ;;  %v1802_v19 = vperm.slane %v1495_v18, 3 }
  0xc7   : > { %v487_v22 = vadd.f32 %v479_v57, %v460_v21  ;;  %v1799_v21 = vperm.slane %v1480_v2, 3 }
  0xc8   : > { %v1574_v10 = vpop.permute.xlu2 %505  ;;  %v423_v48 = vpop.permute.xlu1 %422  ;;  %v482_v36 = vmul.f32 %v1802_v19, %v1331_v31  ;;  %v520_v31 = vperm.slane %v1560_v8, 2 }
  0xc9   : > { %v514_v35 = vsel %vm377_vm4, %v1574_v10, %v1509_v33  ;;  %v340_v32 = vmul.f32 %v1799_v21, %v1313_v25  ;;  %v432_v6 = vsel %vm428_vm5, %v1461_v60, %v423_v48  ;;  %v421_v26 = vpop.permute.xlu0 %420 }
  0xca   : > { %v530_v23 = vmul.f32 %v518_v14, %v514_v35  ;;  %v453_v34 = vmul.f32 %v441_v7, %v432_v6  ;;  %v429_v45 = vsel %vm428_vm5, %v421_v26, %v1478_v1  ;;  %v431_v46 = vsel %vm428_vm5, %v417_v39, %v421_v26 }
  0xcb   : > { %v449_v25 = vmul.f32 %v441_v7, %v431_v46  ;;  %v450_v49 = vmul.f32 %v442_v29, %v429_v45  ;;  %v358_v12 = vadd.f32 %v1800_v63, %v340_v32  ;;  %v1801_v1 = vperm.slane %v1505_v28, 3 }
  0xcc   : > { %v1599_v2 = vadd.f32 %v530_v23, %v487_v22  ;;  %v461_v11 = vadd.f32 %v453_v34, %v409_v15  ;;  %v481_v35 = vmul.f32 %v1798_v0, %v1283_v13  ;;  %v519_v13 = vperm.slane %v1560_v8, 1 }
  0xcd   : > { %v457_v60 = vadd.f32 %v449_v25, %v405_v27  ;;  %v458_v57 = vadd.f32 %v450_v49, %v406_v4  ;;  %v403_v17 = vmul.f32 %v1801_v1, %v1516_v38  ;;  %v410_v38 = vadd.f32 %v402_v37, %v357_v58 }
  0xce   : > { %v488_v5 = vadd.f32 %v480_v54, %v461_v11  ;;  %v521_v27 = vperm.slane %v1560_v8, 3 }
  0xcf   : > { %v484_v61 = vadd.f32 %v476_v44, %v457_v60  ;;  %v485_v16 = vadd.f32 %v477_v30, %v458_v57  ;;  %v411_v54 = vadd.f32 %v403_v17, %v358_v12  ;;  %v1803_v30 = vperm.slane %v1499_v20, 3  ;;  %v567_v17 = vld [vmem:[#allocation5 + $0x5] ss:$8 sm:$0xf] }
  0xd0   : > { %v547_v39 = vpop.permute.xlu2 %546  ;;  %v492_v22 = vpop.permute.xlu1 %491  ;;  %v569_v8 = vperm.slane %v567_v17, 0 }
  0xd1   : > { %v427_v7 = vpop.permute.xlu0 %426 }
  0xd2   : > { %v430_v62 = vsel %vm428_vm5, %v423_v48, %v427_v7  ;;  %v436_v28 = vsel %vm428_vm5, %v427_v7, %v1551_v24 }
  0xd3   : > { %v454_v3 = vmul.f32 %v442_v29, %v430_v62  ;;  %v455_v44 = vmul.f32 %v1803_v30, %v436_v28  ;;  %v570_v62 = vperm.slane %v567_v17, 1 }
  0xd5   : > { %v462_v9 = vadd.f32 %v454_v3, %v410_v38  ;;  %v463_v15 = vadd.f32 %v455_v44, %v411_v54 }
  0xd7   : > { %v489_v18 = vadd.f32 %v481_v35, %v462_v9  ;;  %v490_v32 = vadd.f32 %v482_v36, %v463_v15 }
  0xd8   : > { %v553_v21 = vpop.permute.xlu2 %552  ;;  %v498_v48 = vpop.permute.xlu1 %497 }
  0xd9   : > { %v512_v24 = vsel %vm377_vm4, %v1509_v33, %v498_v48  ;;  %v496_v6 = vpop.permute.xlu0 %495 }
  0xda   : > { %v531_v23 = vmul.f32 %v519_v13, %v512_v24  ;;  %v509_v20 = vsel %vm377_vm4, %v496_v6, %v1540_v40  ;;  %v511_v29 = vsel %vm377_vm4, %v492_v22, %v496_v6  ;;  %v572_v24 = vperm.slane %v567_v17, 3 }
  0xdb   : > { %v527_v26 = vmul.f32 %v519_v13, %v511_v29  ;;  %v528_v4 = vmul.f32 %v520_v31, %v509_v20 }
  0xdc   : > { %v539_v34 = vadd.f32 %v531_v23, %v488_v5 }
  0xdd   : > { %v535_v45 = vadd.f32 %v527_v26, %v484_v61  ;;  %v536_v46 = vadd.f32 %v528_v4, %v485_v16 }
  0xe0   : > { %v594_v25 = vpop.permute.xlu2 %593  ;;  %v504_v49 = vpop.permute.xlu1 %503 }
  0xe1   : > { %v507_v33 = vsel %vm377_vm4, %v1540_v40, %v504_v49  ;;  %v513_v11 = vsel %vm377_vm4, %v504_v49, %v492_v22  ;;  %v502_v60 = vpop.permute.xlu0 %501 }
  0xe2   : > { %v526_v57 = vmul.f32 %v518_v14, %v513_v11  ;;  %v529_v58 = vmul.f32 %v521_v27, %v507_v33  ;;  %v508_v63 = vsel %vm377_vm4, %v502_v60, %v1574_v10  ;;  %v510_v12 = vsel %vm377_vm4, %v498_v48, %v502_v60  ;;  %v1647_v10 = vld [vmem:[#allocation5 + $0x6] ss:$8 sm:$0xf] }
  0xe3   : > { %v532_v5 = vmul.f32 %v520_v31, %v510_v12  ;;  %v533_v37 = vmul.f32 %v521_v27, %v508_v63  ;;  %v620_v36 = vperm.slane %v1647_v10, 0 }
  0xe4   : > { %v534_v1 = vadd.f32 %v526_v57, %v1571_v50  ;;  %v537_v40 = vadd.f32 %v529_v58, %v1553_v41 }
  0xe5   : > { %v540_v61 = vadd.f32 %v532_v5, %v489_v18  ;;  %v541_v16 = vadd.f32 %v533_v37, %v490_v32 }
  0xe8   : > { %v600_v22 = vpop.permute.xlu2 %599  ;;  %v545_v14 = vpop.permute.xlu1 %544 }
  0xe9   : > { %v543_v7 = vpop.permute.xlu0 %542 }
  0xea   : > { %v562_v0 = vsel %vm428_vm5, %v543_v7, %v547_v39 }
  0xeb   : > { %v577_v35 = vmul.f32 %v569_v8, %v562_v0 }
  0xed   : > { %v585_v19 = vadd.f32 %v577_v35, %v534_v1 }
  0xf0   : > { %v606_v50 = vpop.permute.xlu2 %605  ;;  %v551_v28 = vpop.permute.xlu1 %550 }
  0xf1   : > { %v615_v41 = vsel %vm377_vm4, %v606_v50, %v594_v25  ;;  %v560_v38 = vsel %vm428_vm5, %v547_v39, %v551_v28  ;;  %v549_v3 = vpop.permute.xlu0 %548  ;;  %v571_v39 = vperm.slane %v567_v17, 2 }
  0xf2   : > { %v628_v54 = vmul.f32 %v620_v36, %v615_v41  ;;  %v578_v30 = vmul.f32 %v570_v62, %v560_v38  ;;  %v561_v44 = vsel %vm428_vm5, %v549_v3, %v553_v21  ;;  %v563_v9 = vsel %vm428_vm5, %v545_v14, %v549_v3  ;;  %v1694_v3 = vld [vmem:[#allocation5 + $0x20] ss:$8 sm:$0xf] }
  0xf3   : > { %v581_v13 = vmul.f32 %v569_v8, %v563_v9  ;;  %v582_v31 = vmul.f32 %v570_v62, %v561_v44  ;;  %v674_v9 = vperm.slane %v1694_v3, 3 }
  0xf4   : > { %v1660_v15 = vadd.f32 %v628_v54, %v585_v19  ;;  %v586_v18 = vadd.f32 %v578_v30, %v535_v45  ;;  %v696_v54 = vld [vmem:[#allocation5 + $0x7] ss:$8 sm:$0xf] }
  0xf5   : > { %v589_v32 = vadd.f32 %v581_v13, %v1599_v2  ;;  %v590_v48 = vadd.f32 %v582_v31, %v539_v34  ;;  %v701_v44 = vperm.slane %v696_v54, 3 }
  0xf8   : > { %v557_v6 = vpop.permute.xlu1 %556  ;;  %v647_v49 = vpop.permute.xlu2 %646 }
  0xf9   : > { %v559_v23 = vsel %vm428_vm5, %v553_v21, %v557_v6  ;;  %v565_v20 = vsel %vm428_vm5, %v557_v6, %v545_v14  ;;  %v555_v29 = vpop.permute.xlu0 %554  ;;  %v621_v21 = vperm.slane %v1647_v10, 1  ;;  %v713_v6 = vmul.f32 %v701_v44, %v1403_v51 }
  0xfa   : > { %v583_v26 = vmul.f32 %v571_v39, %v559_v23  ;;  %v584_v4 = vmul.f32 %v572_v24, %v565_v20  ;;  %v558_v27 = vsel %vm428_vm5, %v551_v28, %v555_v29  ;;  %v564_v45 = vsel %vm428_vm5, %v555_v29, %v543_v7 }
  0xfb   : > { %v579_v2 = vmul.f32 %v571_v39, %v558_v27  ;;  %v580_v34 = vmul.f32 %v572_v24, %v564_v45  ;;  %v698_v24 = vperm.slane %v696_v54, 0  ;;  %v672_v45 = vperm.slane %v1694_v3, 1 }
  0xfc   : > { %v591_v33 = vadd.f32 %v583_v26, %v540_v61  ;;  %v592_v11 = vadd.f32 %v584_v4, %v541_v16  ;;  %v671_v26 = vperm.slane %v1694_v3, 0  ;;  %v699_v4 = vperm.slane %v696_v54, 1 }
  0xfd   : > { %v587_v60 = vadd.f32 %v579_v2, %v536_v46  ;;  %v588_v57 = vadd.f32 %v580_v34, %v537_v40  ;;  %v622_v46 = vperm.slane %v1647_v10, 2  ;;  %v623_v40 = vperm.slane %v1647_v10, 3 }
  0xfe   : > { %v706_v34 = vmul.f32 %v698_v24, %v1411_v52  ;;  %v710_v51 = vmul.f32 %v698_v24, %v1381_v43 }
 0x100   : > { %v598_v58 = vpop.permute.xlu1 %597  ;;  %v1678_v14 = vpop.permute.xlu2 %652 }
 0x101   : > { %v613_v63 = vsel %vm377_vm4, %v594_v25, %v598_v58  ;;  %v596_v12 = vpop.permute.xlu0 %595 }
 0x102   : > { %v629_v5 = vmul.f32 %v621_v21, %v613_v63  ;;  %v614_v37 = vsel %vm377_vm4, %v596_v12, %v600_v22  ;;  %v700_v63 = vperm.slane %v696_v54, 2 }
 0x103   : > { %v633_v1 = vmul.f32 %v621_v21, %v614_v37  ;;  %v673_v37 = vperm.slane %v1694_v3, 2 }
 0x104   : > { %v637_v17 = vadd.f32 %v629_v5, %v586_v18  ;;  %v712_v54 = vmul.f32 %v700_v63, %v1389_v47 }
 0x105   : > { %v1676_v8 = vadd.f32 %v633_v1, %v590_v48 }
 0x108   : > { %v604_v61 = vpop.permute.xlu1 %603 }
 0x109   : > { %v612_v16 = vsel %vm377_vm4, %v600_v22, %v604_v61  ;;  %v602_v25 = vpop.permute.xlu0 %601  ;;  %v659_v22 = vpop.permute.xlu2 %658 }
 0x10a   : > { %v634_v7 = vmul.f32 %v622_v46, %v612_v16  ;;  %v609_v0 = vsel %vm377_vm4, %v602_v25, %v606_v50  ;;  %v611_v35 = vsel %vm377_vm4, %v598_v58, %v602_v25  ;;  %v667_v13 = vsel %vm428_vm5, %v659_v22, %v647_v49 }
 0x10b   : > { %v630_v19 = vmul.f32 %v622_v46, %v611_v35  ;;  %v631_v62 = vmul.f32 %v623_v40, %v609_v0  ;;  %v686_v23 = vmul.f32 %v674_v9, %v667_v13  ;;  %v709_v46 = vmul.f32 %v701_v44, %v1431_v55 }
 0x10c   : > { %v1688_v28 = vadd.f32 %v634_v7, %v591_v33 }
 0x10d   : > { %v1690_v41 = vadd.f32 %v630_v19, %v587_v60  ;;  %v1692_v38 = vadd.f32 %v631_v62, %v588_v57  ;;  %v707_v57 = vmul.f32 %v699_v4, %v1421_v53  ;;  %v711_v62 = vmul.f32 %v699_v4, %v1379_v42 }
 0x110   : > { %v645_v30 = vpop.permute.xlu1 %644 }
 0x111   : > { %v608_v50 = vpop.permute.xlu0 %607 }
 0x112   : > { %v610_v31 = vsel %vm377_vm4, %v604_v61, %v608_v50  ;;  %v616_v18 = vsel %vm377_vm4, %v608_v50, %v596_v12 }
 0x113   : > { %v632_v48 = vmul.f32 %v620_v36, %v616_v18  ;;  %v635_v39 = vmul.f32 %v623_v40, %v610_v31  ;;  %v708_v40 = vmul.f32 %v700_v63, %v1435_v56 }
 0x115   : > { %v640_v20 = vadd.f32 %v632_v48, %v589_v32  ;;  %v643_v29 = vadd.f32 %v635_v39, %v592_v11 }
 0x117   : > { %v694_v27 = vadd.f32 %v686_v23, %v643_v29 }
 0x118   : > { %v651_v2 = vpop.permute.xlu1 %650 }
 0x119   : > { %v721_v33 = vadd.f32 %v713_v6, %v694_v27  ;;  %v665_v10 = vsel %vm428_vm5, %v647_v49, %v651_v2  ;;  %v649_v36 = vpop.permute.xlu0 %648 }
 0x11a   : > { %v683_v60 = vmul.f32 %v671_v26, %v665_v10  ;;  %v662_v32 = vsel %vm428_vm5, %v649_v36, %v1678_v14  ;;  %v664_v11 = vsel %vm428_vm5, %v645_v30, %v649_v36 }
 0x11b   : > { %v729_v21 = vmax.f32 %v721_v33, 0.0  ;;  %v679_v58 = vmul.f32 %v671_v26, %v664_v11  ;;  %v680_v52 = vmul.f32 %v672_v45, %v662_v32 }
 0x11c   : > { %v691_v12 = vadd.f32 %v683_v60, %v640_v20 }
 0x11d   : > { %737 = vst [vmem:[%s1720_s29 + $0x38] sm:$0xff] %v729_v21  ;;  %v687_v43 = vadd.f32 %v679_v58, %v1660_v15  ;;  %v688_v49 = vadd.f32 %v680_v52, %v637_v17 }
 0x11e   : > { %v718_v5 = vadd.f32 %v710_v51, %v691_v12 }
 0x11f   : > { %v714_v1 = vadd.f32 %v706_v34, %v687_v43  ;;  %v715_v53 = vadd.f32 %v707_v57, %v688_v49 }
 0x120   : > { %v726_v61 = vmax.f32 %v718_v5, 0.0  ;;  %v657_v16 = vpop.permute.xlu1 %656 }
 0x121   : > { %v722_v25 = vmax.f32 %v714_v1, 0.0  ;;  %v723_v7 = vmax.f32 %v715_v53, 0.0  ;;  %v660_v15 = vsel %vm428_vm5, %v1678_v14, %v657_v16  ;;  %v666_v17 = vsel %vm428_vm5, %v657_v16, %v645_v30  ;;  %v655_v0 = vpop.permute.xlu0 %654 }
 0x122   : > { %734 = vst [vmem:[%s1720_s29 + $0x20] sm:$0xff] %v726_v61  ;;  %v681_v35 = vmul.f32 %v673_v37, %v660_v15  ;;  %v682_v19 = vmul.f32 %v674_v9, %v666_v17  ;;  %v661_v55 = vsel %vm428_vm5, %v655_v0, %v659_v22  ;;  %v663_v56 = vsel %vm428_vm5, %v651_v2, %v655_v0 }
 0x123   : > { %730 = vst [vmem:[%s1720_s29] sm:$0xff] %v722_v25  ;;  %v684_v14 = vmul.f32 %v672_v45, %v663_v56  ;;  %v685_v3 = vmul.f32 %v673_v37, %v661_v55 }
 0x124   : > { %731 = vst [vmem:[%s1720_s29 + $0x8] sm:$0xff] %v723_v7  ;;  %v689_v30 = vadd.f32 %v681_v35, %v1690_v41  ;;  %v690_v44 = vadd.f32 %v682_v19, %v1692_v38 }
 0x125   : > { %v692_v22 = vadd.f32 %v684_v14, %v1676_v8  ;;  %v693_v59 = vadd.f32 %v685_v3, %v1688_v28 }
 0x126   : > { %v716_v42 = vadd.f32 %v708_v40, %v689_v30  ;;  %v717_v47 = vadd.f32 %v709_v46, %v690_v44 }
 0x127   : > { %v719_v9 = vadd.f32 %v711_v62, %v692_v22  ;;  %v720_v50 = vadd.f32 %v712_v54, %v693_v59 }
 0x128   : > { %v724_v41 = vmax.f32 %v716_v42, 0.0  ;;  %v725_v38 = vmax.f32 %v717_v47, 0.0 }
 0x129   : > { %v727_v13 = vmax.f32 %v719_v9, 0.0  ;;  %v728_v8 = vmax.f32 %v720_v50, 0.0 }
 0x12a   : > { %732 = vst [vmem:[%s1720_s29 + $0x10] sm:$0xff] %v724_v41 }
 0x12b   : > { %733 = vst [vmem:[%s1720_s29 + $0x18] sm:$0xff] %v725_v38 }
 0x12c   : > { %735 = vst [vmem:[%s1720_s29 + $0x28] sm:$0xff] %v727_v13 }
 0x12d   : > { %736 = vst [vmem:[%s1720_s29 + $0x30] sm:$0xff] %v728_v8 }
 0x12e   : > { %1063 = shalt.err (!%p1060_p10)
}
 0x12f   : > { %s1115_s11 = smov 512  }
 0x130   : > { %883 = dma.vmem_to_hbm [thread:$0]  (%p1205_p3), %s753_s28, 1024, %s755_s4, %s739_s7, %s1115_s11, %s1115_s11, %s1112_s18  }
 0x131 PF: > { %s769_s5 = sand.u32 1, %s1094_s12   ;;  %p1804_p12 = scmp.ge.s32.totalorder %s1106_s15, 2 }
 0x132   : > { %s770_s23 = scalar_lea.sflag [#allocation4], %s769_s5 }
 0x133   : > { %p897_p13 = pnand %p1804_p12, %p1171_p6 }
 0x135   : > { %p898_p0 = pneg %p897_p13 }
 0x137   : > { %1089 = dma.done.wait (%p898_p0), %s770_s23, 1024  }
 0x138   : > { %1091 = vsyncadd (%p898_p0), %s770_s23, 4294966272  ;;  %p17_p5 = scmp.ge.s32.totalorder %s1195_s6, 4   ;;  %s1805_s12 = smov %s1098_s13 }
 0x139   : > { %s1806_s13 = smov %s1102_s14  ;;  %s1807_s14 = smov %s1211_s10 }
 0x13a   : > { %s1808_s15 = smov %s1195_s6  ;;  %19 = sbr.rel (!%p17_p5) target bundleno = 6 (0x6), region = 93 }
 0x13f   :  { %776 = vsyncpa [#allocation3], 1 }
 0x140   :  { %778 = vsyncpa [#allocation3 + $0x1], 1 }
 0x141   :  { %779 = vsyncpa [#allocation6], 1 }
 0x142   :  { %780 = vsyncpa [#allocation4], 1 }
 0x143   :  { %782 = vsyncpa [#allocation4 + $0x1], 1 }

</bundles_post_ra>
